<compile_context>
chip_gen: v6e
topology: v6e:2x2x1
jax: 0.10.0
libtpu: 0.0.40
codegen_flags: <defaults>
</compile_context>

<pallas_src>
import functools

import jax
import jax.numpy as jnp
import numpy as np
from jax.experimental import pallas as pl
from jax.experimental.pallas import tpu as pltpu

_LANE = 128
_SUBLANE = 8


def _round_up(x, m):
    return (x + m - 1) // m * m


# ---------------------------------------------------------------------------
# Fused kernel (built per network topology)
# ---------------------------------------------------------------------------
def _make_fused_kernel(num_hidden):
    """Kernel for one batch tile: ([Linear -> PReLU] * num_hidden) -> Linear."""

    def kernel(*refs):
        # refs = (alphas, x, w0, b0, w1, b1, ..., wL, bL, out)
        alphas_ref = refs[0]
        x_ref = refs[1]
        o_ref = refs[-1]
        wb_refs = refs[2:-1]

        h = x_ref[...]                                  # (TILE_B, D0_pad), compute dtype
        for k in range(num_hidden):
            w_ref = wb_refs[2 * k]
            b_ref = wb_refs[2 * k + 1]
            y = jnp.dot(h, w_ref[...], preferred_element_type=jnp.float32)
            y = y + b_ref[...].astype(jnp.float32)      # bias broadcast (1, D) -> (TILE_B, D)
            a = alphas_ref[k]                           # scalar PReLU alpha from SMEM
            y = jnp.where(y >= 0.0, y, a * y)           # PReLU epilogue kept in f32 (v5e VPU)
            h = y.astype(x_ref.dtype)                   # next matmul input in compute dtype

        w_ref = wb_refs[-2]
        b_ref = wb_refs[-1]
        y = jnp.dot(h, w_ref[...], preferred_element_type=jnp.float32)
        o_ref[...] = (y + b_ref[...].astype(jnp.float32)).astype(o_ref.dtype)

    return kernel


# ---------------------------------------------------------------------------
# Wrapper: pad to lane-dense shapes, grid over batch, single pallas_call
# ---------------------------------------------------------------------------
@functools.partial(jax.jit, static_argnames=("compute_dtype", "tile_b"))
def linear_head_forward(params, x, *, compute_dtype=jnp.float32, tile_b=None):
    weights = params["weights"]          # list of (Din_k, Dout_k) f32
    biases = params["biases"]            # list of (Dout_k,) f32
    alphas = params["alphas"]            # (num_hidden,) f32
    num_layers = len(weights)
    num_hidden = num_layers - 1

    B, Din = x.shape
    dims = [Din] + [w.shape[1] for w in weights]
    dims_pad = [_round_up(d, _LANE) for d in dims]      # lane-dense feature dims

    if tile_b is None:
        tile_b = min(512, _round_up(B, _SUBLANE))       # fill sublanes; amortize per-step cost
    B_pad = _round_up(B, tile_b)
    grid = (B_pad // tile_b,)

    # ---- pad operands (zero padding is exact: PReLU(0)=0, zero rows/cols add nothing) ----
    x_p = jnp.pad(x.astype(compute_dtype),
                  ((0, B_pad - B), (0, dims_pad[0] - Din)))
    w_p, b_p = [], []
    for k in range(num_layers):
        w_p.append(jnp.pad(weights[k].astype(compute_dtype),
                           ((0, dims_pad[k] - dims[k]),
                            (0, dims_pad[k + 1] - dims[k + 1]))))
        b_p.append(jnp.pad(biases[k],
                           (0, dims_pad[k + 1] - dims[k + 1])).reshape(1, dims_pad[k + 1]))

    # ---- BlockSpecs ----
    in_specs = [pl.BlockSpec(memory_space=pltpu.MemorySpace.SMEM)]            # alphas
    in_specs.append(pl.BlockSpec((tile_b, dims_pad[0]), lambda i: (i, 0)))    # x tile (streamed)
    operands = [alphas, x_p]
    for k in range(num_layers):
        # constant index maps -> weights/biases stay VMEM-resident across the grid
        in_specs.append(pl.BlockSpec((dims_pad[k], dims_pad[k + 1]), lambda i: (0, 0)))
        in_specs.append(pl.BlockSpec((1, dims_pad[k + 1]), lambda i: (0, 0)))
        operands.append(w_p[k])
        operands.append(b_p[k])
    out_spec = pl.BlockSpec((tile_b, dims_pad[-1]), lambda i: (i, 0))

    # ---- VMEM budget: double-buffered streamed tiles + resident params + temps ----
    itemsize = jnp.dtype(compute_dtype).itemsize
    w_bytes = sum(dims_pad[k] * dims_pad[k + 1] * itemsize for k in range(num_layers))
    b_bytes = sum(d * 4 for d in dims_pad[1:])
    x_tile_bytes = tile_b * dims_pad[0] * itemsize
    o_tile_bytes = tile_b * dims_pad[-1] * 4
    inter_bytes = 4 * tile_b * max(dims_pad) * 4
    vmem_limit = 2 * (w_bytes + b_bytes + x_tile_bytes + o_tile_bytes) + inter_bytes + (4 << 20)
    vmem_limit = int(min(max(vmem_limit, 16 << 20), 64 << 20))  # fits v7x 64 MiB physical

    out_p = pl.pallas_call(
        _make_fused_kernel(num_hidden),
        out_shape=jax.ShapeDtypeStruct((B_pad, dims_pad[-1]), jnp.float32),
        grid=grid,
        in_specs=in_specs,
        out_specs=out_spec,
        compiler_params=pltpu.CompilerParams(
            dimension_semantics=("parallel",),          # shard batch tiles across v7x TCs
            vmem_limit_bytes=vmem_limit,
        ),
    )(*operands)

    return out_p[:B, :dims[-1]]


# ---------------------------------------------------------------------------
# Parameter init (Kaiming-uniform-ish, like torch.nn.Linear) + pure-JAX reference
# ---------------------------------------------------------------------------
def init_linear_head_params(key, input_dim, hidden_features, output_dim):
    weights, biases = [], []
    dims = [input_dim] + list(hidden_features) + [output_dim]
    for k in range(len(dims) - 1):
        key, kw, kb = jax.random.split(key, 3)
        fan_in = dims[k]
        bound = 1.0 / np.sqrt(fan_in)
        weights.append(jax.random.uniform(kw, (dims[k], dims[k + 1]), jnp.float32, -bound, bound))
        biases.append(jax.random.uniform(kb, (dims[k + 1],), jnp.float32, -bound, bound))
    alphas = jnp.full((len(hidden_features),), 0.25, dtype=jnp.float32)  # PReLU default
    return {"weights": weights, "biases": biases, "alphas": alphas}


def linear_head_reference(params, x):
    weights, biases, alphas = params["weights"], params["biases"], params["alphas"]
    num_hidden = len(weights) - 1
    for k in range(num_hidden):
        x = x @ weights[k] + biases[k]
        x = jnp.where(x >= 0.0, x, alphas[k] * x)
    return x @ weights[-1] + biases[-1]


# ---------------------------------------------------------------------------
if __name__ == "__main__":
    key = jax.random.PRNGKey(0)
    key, kx, kp = jax.random.split(key, 3)

    batch = 8
    input_dim = 32
    hidden_features = [64, 48]
    output_dim = 16

    x = jax.random.normal(kx, (batch, input_dim), dtype=jnp.float32)
    params = init_linear_head_params(kp, input_dim, hidden_features, output_dim)

    out = linear_head_forward(params, x)                 # f32 compute (matches torch numerics)
    out = jax.block_until_ready(out)

    ref = linear_head_reference(params, x)
    np.testing.assert_allclose(np.asarray(out), np.asarray(ref), rtol=1e-5, atol=1e-5)

    # bf16 MXU path (v6e/v7x): x/W in bf16, f32 accumulation — looser tolerance.
    out_bf16 = jax.block_until_ready(
        linear_head_forward(params, x, compute_dtype=jnp.bfloat16))
    np.testing.assert_allclose(np.asarray(out_bf16), np.asarray(ref), rtol=3e-2, atol=3e-2)

    print("KERNEL_OK")
</pallas_src>

<mosaic_0001>
module attributes {stable_mosaic.version = 11 : i64} {
  func.func @kernel(%arg0: i32, %arg1: memref<2xf32, #tpu.memory_space<smem>>, %arg2: memref<8x128xf32, #tpu.memory_space<vmem>>, %arg3: memref<128x128xf32, #tpu.memory_space<vmem>>, %arg4: memref<1x128xf32, #tpu.memory_space<vmem>>, %arg5: memref<128x128xf32, #tpu.memory_space<vmem>>, %arg6: memref<1x128xf32, #tpu.memory_space<vmem>>, %arg7: memref<128x128xf32, #tpu.memory_space<vmem>>, %arg8: memref<1x128xf32, #tpu.memory_space<vmem>>, %arg9: memref<8x128xf32, #tpu.memory_space<vmem>>) attributes {dimension_semantics = [#tpu.dimension_semantics<parallel>], iteration_bounds = array<i64: 1>, scalar_prefetch = 0 : i64, scratch_operands = 0 : i64, tpu.core_type = #tpu.core_type<tc>, window_params = [{transform_indices = @transform_0, window_bounds = array<i64: 2>}, {transform_indices = @transform_1, window_bounds = array<i64: 8, 128>}, {pipeline_mode = #tpu.pipeline_mode<synchronous>, transform_indices = @transform_2, window_bounds = array<i64: 128, 128>}, {pipeline_mode = #tpu.pipeline_mode<synchronous>, transform_indices = @transform_3, window_bounds = array<i64: 1, 128>}, {pipeline_mode = #tpu.pipeline_mode<synchronous>, transform_indices = @transform_4, window_bounds = array<i64: 128, 128>}, {pipeline_mode = #tpu.pipeline_mode<synchronous>, transform_indices = @transform_5, window_bounds = array<i64: 1, 128>}, {pipeline_mode = #tpu.pipeline_mode<synchronous>, transform_indices = @transform_6, window_bounds = array<i64: 128, 128>}, {pipeline_mode = #tpu.pipeline_mode<synchronous>, transform_indices = @transform_7, window_bounds = array<i64: 1, 128>}, {transform_indices = @transform_8, window_bounds = array<i64: 8, 128>}]} {
    %c0 = arith.constant 0 : index
    %c0_0 = arith.constant 0 : index
    %0 = vector.load %arg2[%c0, %c0_0] : memref<8x128xf32, #tpu.memory_space<vmem>>, vector<8x128xf32>
    %c0_1 = arith.constant 0 : index
    %c0_2 = arith.constant 0 : index
    %1 = vector.load %arg3[%c0_1, %c0_2] : memref<128x128xf32, #tpu.memory_space<vmem>>, vector<128x128xf32>
    %cst = arith.constant dense<0.000000e+00> : vector<8x128xf32>
    %2 = tpu.matmul %0, %1, %cst {dimension_numbers = #tpu.dot_dimension_numbers<[1], [0], [0], [1], [0, 0, 1, 1], [], []>} : vector<8x128xf32>, vector<128x128xf32>, vector<8x128xf32> -> vector<8x128xf32>
    %c0_3 = arith.constant 0 : index
    %c0_4 = arith.constant 0 : index
    %3 = vector.load %arg4[%c0_3, %c0_4] : memref<1x128xf32, #tpu.memory_space<vmem>>, vector<1x128xf32>
    %4 = vector.broadcast %3 : vector<1x128xf32> to vector<8x128xf32>
    %5 = arith.addf %2, %4 : vector<8x128xf32>
    %c0_5 = arith.constant 0 : index
    %6 = memref.load %arg1[%c0_5] : memref<2xf32, #tpu.memory_space<smem>>
    %cst_6 = arith.constant 0.000000e+00 : f32
    %7 = vector.broadcast %cst_6 : f32 to vector<8x128xf32>
    %8 = arith.cmpf oge, %5, %7 : vector<8x128xf32>
    %9 = vector.broadcast %6 : f32 to vector<8x128xf32>
    %10 = arith.mulf %9, %5 : vector<8x128xf32>
    %11 = arith.select %8, %5, %10 : vector<8x128xi1>, vector<8x128xf32>
    %c0_7 = arith.constant 0 : index
    %c0_8 = arith.constant 0 : index
    %12 = vector.load %arg5[%c0_7, %c0_8] : memref<128x128xf32, #tpu.memory_space<vmem>>, vector<128x128xf32>
    %cst_9 = arith.constant dense<0.000000e+00> : vector<8x128xf32>
    %13 = tpu.matmul %11, %12, %cst_9 {dimension_numbers = #tpu.dot_dimension_numbers<[1], [0], [0], [1], [0, 0, 1, 1], [], []>} : vector<8x128xf32>, vector<128x128xf32>, vector<8x128xf32> -> vector<8x128xf32>
    %c0_10 = arith.constant 0 : index
    %c0_11 = arith.constant 0 : index
    %14 = vector.load %arg6[%c0_10, %c0_11] : memref<1x128xf32, #tpu.memory_space<vmem>>, vector<1x128xf32>
    %15 = vector.broadcast %14 : vector<1x128xf32> to vector<8x128xf32>
    %16 = arith.addf %13, %15 : vector<8x128xf32>
    %c1 = arith.constant 1 : index
    %17 = memref.load %arg1[%c1] : memref<2xf32, #tpu.memory_space<smem>>
    %cst_12 = arith.constant 0.000000e+00 : f32
    %18 = vector.broadcast %cst_12 : f32 to vector<8x128xf32>
    %19 = arith.cmpf oge, %16, %18 : vector<8x128xf32>
    %20 = vector.broadcast %17 : f32 to vector<8x128xf32>
    %21 = arith.mulf %20, %16 : vector<8x128xf32>
    %22 = arith.select %19, %16, %21 : vector<8x128xi1>, vector<8x128xf32>
    %c0_13 = arith.constant 0 : index
    %c0_14 = arith.constant 0 : index
    %23 = vector.load %arg7[%c0_13, %c0_14] : memref<128x128xf32, #tpu.memory_space<vmem>>, vector<128x128xf32>
    %cst_15 = arith.constant dense<0.000000e+00> : vector<8x128xf32>
    %24 = tpu.matmul %22, %23, %cst_15 {dimension_numbers = #tpu.dot_dimension_numbers<[1], [0], [0], [1], [0, 0, 1, 1], [], []>} : vector<8x128xf32>, vector<128x128xf32>, vector<8x128xf32> -> vector<8x128xf32>
    %c0_16 = arith.constant 0 : index
    %c0_17 = arith.constant 0 : index
    %25 = vector.load %arg8[%c0_16, %c0_17] : memref<1x128xf32, #tpu.memory_space<vmem>>, vector<1x128xf32>
    %26 = vector.broadcast %25 : vector<1x128xf32> to vector<8x128xf32>
    %27 = arith.addf %24, %26 : vector<8x128xf32>
    %c0_18 = arith.constant 0 : index
    %c0_19 = arith.constant 0 : index
    %28 = vector.load %arg9[%c0_18, %c0_19] : memref<8x128xf32, #tpu.memory_space<vmem>>, vector<8x128xf32>
    tpu.vector_store %arg9[%c0_18, %c0_19], %27 {strides = array<i32>} : memref<8x128xf32, #tpu.memory_space<vmem>>, vector<8x128xf32>,
    return
  }
  func.func @transform_0(%arg0: i32) -> i32 {
    %c0_i32 = arith.constant 0 : i32
    %c0_i32_0 = arith.constant 0 : i32
    return %c0_i32 : i32
  }
  func.func @transform_1(%arg0: i32) -> (i32, i32) {
    %c0_i32 = arith.constant 0 : i32
    %c0_i32_0 = arith.constant 0 : i32
    return %arg0, %c0_i32 : i32, i32
  }
  func.func @transform_2(%arg0: i32) -> (i32, i32) {
    %c0_i32 = arith.constant 0 : i32
    %c0_i32_0 = arith.constant 0 : i32
    %c0_i32_1 = arith.constant 0 : i32
    return %c0_i32, %c0_i32_0 : i32, i32
  }
  func.func @transform_3(%arg0: i32) -> (i32, i32) {
    %c0_i32 = arith.constant 0 : i32
    %c0_i32_0 = arith.constant 0 : i32
    %c0_i32_1 = arith.constant 0 : i32
    return %c0_i32, %c0_i32_0 : i32, i32
  }
  func.func @transform_4(%arg0: i32) -> (i32, i32) {
    %c0_i32 = arith.constant 0 : i32
    %c0_i32_0 = arith.constant 0 : i32
    %c0_i32_1 = arith.constant 0 : i32
    return %c0_i32, %c0_i32_0 : i32, i32
  }
  func.func @transform_5(%arg0: i32) -> (i32, i32) {
    %c0_i32 = arith.constant 0 : i32
    %c0_i32_0 = arith.constant 0 : i32
    %c0_i32_1 = arith.constant 0 : i32
    return %c0_i32, %c0_i32_0 : i32, i32
  }
  func.func @transform_6(%arg0: i32) -> (i32, i32) {
    %c0_i32 = arith.constant 0 : i32
    %c0_i32_0 = arith.constant 0 : i32
    %c0_i32_1 = arith.constant 0 : i32
    return %c0_i32, %c0_i32_0 : i32, i32
  }
  func.func @transform_7(%arg0: i32) -> (i32, i32) {
    %c0_i32 = arith.constant 0 : i32
    %c0_i32_0 = arith.constant 0 : i32
    %c0_i32_1 = arith.constant 0 : i32
    return %c0_i32, %c0_i32_0 : i32, i32
  }
  func.func @transform_8(%arg0: i32) -> (i32, i32) {
    %c0_i32 = arith.constant 0 : i32
    %c0_i32_0 = arith.constant 0 : i32
    return %arg0, %c0_i32 : i32, i32
  }
}

</mosaic_0001>

<bundles_post_ra>
// kernel: linear_head_forward.1
= control target key start
LH: loop header
LB: loop body
LE: loop exit
PB: predicated region body
PF: predicated region fallthrough
CT: control target
= control target key end

     0   :  { %13 = vsyncpa [#allocation4], 0  ;;  %s814_s0 = inlined_call_operand.vmem [shape: f32[2], index: 0, kind: input, shape index: {}]   ;;  %s815_s1 = inlined_call_operand.vmem [shape: f32[8,128], index: 1, kind: input, shape index: {}]   ;;  %s816_s2 = inlined_call_operand.vmem [shape: f32[128,128], index: 2, kind: input, shape index: {}]   ;;  %s817_s3 = inlined_call_operand.vmem [shape: f32[1,128], index: 3, kind: input, shape index: {}]   ;;  %s818_s4 = inlined_call_operand.vmem [shape: f32[128,128], index: 4, kind: input, shape index: {}]   ;;  %s819_s5 = inlined_call_operand.vmem [shape: f32[1,128], index: 5, kind: input, shape index: {}]   ;;  %s820_s6 = inlined_call_operand.vmem [shape: f32[128,128], index: 6, kind: input, shape index: {}]   ;;  %s821_s7 = inlined_call_operand.vmem [shape: f32[1,128], index: 7, kind: input, shape index: {}]   ;;  %s822_s8 = inlined_call_operand.hbm [shape: f32[8,128], index: 8, kind: output, shape index: {}]  }
   0x1   :  { %14 = vsyncpa [#allocation3], 0  ;;  %s21_s29 = sshll.u32 %s814_s0, 4  ;;  %s22_s29 = int_to_ptr.vmem [resolvable:$true] %s21_s29 }
   0x2   :  { %s513_s30 = scalar_lea.vmem %s22_s29, 16  ;;  %p518_p1 = scmp.lt.s32.totalorder %s22_s29, %s22_s29 }
   0x3   :  { %p514_p0 = scmp.ne.s32.totalorder %s22_s29, %s513_s30  ;;  %p519_p2 = scmp.lt.s32.totalorder %s513_s30, %s513_s30 }
   0x5   :  { %p520_p3 = por %p519_p2, %p518_p1 }
   0x7   :  { %p521_p4 = pnand %p520_p3, %p514_p0 }
   0x9   :  { %524 = shalt.err (!%p521_p4)
}
   0xa   :  { %s549_s9 = smov [#allocation2]  }
   0xb   :  { %24 = dma.vmem_to_smem %s22_s29, 16, %s549_s9, [#allocation4]  }
   0xc   :  { %545 = dma.done.wait [#allocation4], 16  }
   0xd   :  { %546 = vsyncadd [#allocation4], 4294967280 }
   0xe   :  { %42 = sfence }
   0xf   :  { %v59_v0 = vld [vmem:[%s816_s2 + $0x78] sm:$0xff]  ;;  %v550_v1 = vmov 0.0   ;;  %v58_v2 = vld [vmem:[%s816_s2 + $0x70] sm:$0xff]  ;;  %vm551_vm0 = vmmov 0   ;;  %v57_v3 = vld [vmem:[%s816_s2 + $0x68] sm:$0xff]  ;;  %s137_s27 = sld [smem:[#allocation2]] }
  0x10   :  { %404 = vmatprep.subr.mxu0 %v550_v1  ;;  %436 = vmatprep.mubr.msk.f32.mxu0 %vm551_vm0, %v550_v1  ;;  %v56_v4 = vld [vmem:[%s816_s2 + $0x60] sm:$0xff]  ;;  %v157_v5 = vld [vmem:[%s818_s4 + $0x78] sm:$0xff]  ;;  %v156_v6 = vld [vmem:[%s818_s4 + $0x70] sm:$0xff]  ;;  %s351_s0 = sld [smem:[#allocation2 + $0x1]] }
  0x11   :  { %405 = vmatpush3.msra.mxu0 %v59_v0  ;;  %439 = vmatprep.subr.mxu1 %v550_v1  ;;  %v55_v7 = vld [vmem:[%s816_s2 + $0x58] sm:$0xff]  ;;  %v155_v8 = vld [vmem:[%s818_s4 + $0x68] sm:$0xff]  ;;  %v54_v9 = vld [vmem:[%s816_s2 + $0x50] sm:$0xff] }
  0x12   :  { %406 = vmatprep.subr.mxu0 %v550_v1  ;;  %471 = vmatprep.mubr.msk.f32.mxu1 %vm551_vm0, %v550_v1  ;;  %v154_v10 = vld [vmem:[%s818_s4 + $0x60] sm:$0xff]  ;;  %v53_v11 = vld [vmem:[%s816_s2 + $0x48] sm:$0xff]  ;;  %v153_v12 = vld [vmem:[%s818_s4 + $0x58] sm:$0xff] }
  0x13   :  { %407 = vmatpush3.msra.mxu0 %v58_v2  ;;  %440 = vmatpush3.msra.mxu1 %v157_v5  ;;  %v52_v13 = vld [vmem:[%s816_s2 + $0x40] sm:$0xff]  ;;  %v152_v14 = vld [vmem:[%s818_s4 + $0x50] sm:$0xff]  ;;  %v51_v15 = vld [vmem:[%s816_s2 + $0x38] sm:$0xff] }
  0x14   :  { %408 = vmatprep.subr.mxu0 %v550_v1  ;;  %441 = vmatprep.subr.mxu1 %v550_v1  ;;  %v151_v16 = vld [vmem:[%s818_s4 + $0x48] sm:$0xff]  ;;  %v50_v17 = vld [vmem:[%s816_s2 + $0x30] sm:$0xff]  ;;  %v150_v18 = vld [vmem:[%s818_s4 + $0x40] sm:$0xff] }
  0x15   :  { %409 = vmatpush3.msra.mxu0 %v57_v3  ;;  %442 = vmatpush3.msra.mxu1 %v156_v6  ;;  %v49_v19 = vld [vmem:[%s816_s2 + $0x28] sm:$0xff]  ;;  %v149_v20 = vld [vmem:[%s818_s4 + $0x38] sm:$0xff]  ;;  %v48_v21 = vld [vmem:[%s816_s2 + $0x20] sm:$0xff]  ;;  %v139_v49 = vstv %s137_s27 }
  0x16   :  { %410 = vmatprep.subr.mxu0 %v550_v1  ;;  %443 = vmatprep.subr.mxu1 %v550_v1  ;;  %v148_v22 = vld [vmem:[%s818_s4 + $0x30] sm:$0xff]  ;;  %v47_v23 = vld [vmem:[%s816_s2 + $0x18] sm:$0xff]  ;;  %v147_v24 = vld [vmem:[%s818_s4 + $0x28] sm:$0xff]  ;;  %v237_v59 = vstv %s351_s0 }
  0x17   :  { %411 = vmatpush3.msra.mxu0 %v56_v4  ;;  %444 = vmatpush3.msra.mxu1 %v155_v8  ;;  %v46_v25 = vld [vmem:[%s816_s2 + $0x10] sm:$0xff]  ;;  %v146_v26 = vld [vmem:[%s818_s4 + $0x20] sm:$0xff]  ;;  %v45_v27 = vld [vmem:[%s816_s2 + $0x8] sm:$0xff] }
  0x18   :  { %412 = vmatprep.subr.mxu0 %v550_v1  ;;  %445 = vmatprep.subr.mxu1 %v550_v1  ;;  %v145_v28 = vld [vmem:[%s818_s4 + $0x18] sm:$0xff]  ;;  %v44_v29 = vld [vmem:[%s816_s2] sm:$0xff]  ;;  %v144_v31 = vld [vmem:[%s818_s4 + $0x10] sm:$0xff] }
  0x19   :  { %413 = vmatpush3.msra.mxu0 %v55_v7  ;;  %446 = vmatpush3.msra.mxu1 %v154_v10  ;;  %v43_v30 = vld [vmem:[%s815_s1] sm:$0xff]  ;;  %v143_v32 = vld [vmem:[%s818_s4 + $0x8] sm:$0xff]  ;;  %v255_v34 = vld [vmem:[%s820_s6 + $0x78] sm:$0xff] }
  0x1a   :  { %414 = vmatprep.subr.mxu0 %v550_v1  ;;  %447 = vmatprep.subr.mxu1 %v550_v1  ;;  %v142_v33 = vld [vmem:[%s818_s4] sm:$0xff]  ;;  %v254_v35 = vld [vmem:[%s820_s6 + $0x70] sm:$0xff]  ;;  %v253_v36 = vld [vmem:[%s820_s6 + $0x68] sm:$0xff] }
  0x1b   :  { %415 = vmatpush3.msra.mxu0 %v54_v9  ;;  %448 = vmatpush3.msra.mxu1 %v153_v12  ;;  %v252_v37 = vld [vmem:[%s820_s6 + $0x60] sm:$0xff]  ;;  %v251_v38 = vld [vmem:[%s820_s6 + $0x58] sm:$0xff]  ;;  %v250_v39 = vld [vmem:[%s820_s6 + $0x50] sm:$0xff] }
  0x1c   :  { %416 = vmatprep.subr.mxu0 %v550_v1  ;;  %449 = vmatprep.subr.mxu1 %v550_v1  ;;  %v249_v40 = vld [vmem:[%s820_s6 + $0x48] sm:$0xff]  ;;  %v248_v41 = vld [vmem:[%s820_s6 + $0x40] sm:$0xff]  ;;  %v247_v42 = vld [vmem:[%s820_s6 + $0x38] sm:$0xff] }
  0x1d   :  { %417 = vmatpush3.msra.mxu0 %v53_v11  ;;  %450 = vmatpush3.msra.mxu1 %v152_v14  ;;  %v246_v43 = vld [vmem:[%s820_s6 + $0x30] sm:$0xff]  ;;  %v245_v44 = vld [vmem:[%s820_s6 + $0x28] sm:$0xff]  ;;  %v244_v45 = vld [vmem:[%s820_s6 + $0x20] sm:$0xff] }
  0x1e   :  { %418 = vmatprep.subr.mxu0 %v550_v1  ;;  %451 = vmatprep.subr.mxu1 %v550_v1  ;;  %v243_v46 = vld [vmem:[%s820_s6 + $0x18] sm:$0xff]  ;;  %v349_v47 = vld [vmem:[%s817_s3] ss:$0 sm:$0xff]  ;;  %v242_v54 = vld [vmem:[%s820_s6 + $0x10] sm:$0xff] }
  0x1f   :  { %419 = vmatpush3.msra.mxu0 %v52_v13  ;;  %452 = vmatpush3.msra.mxu1 %v151_v16  ;;  %v241_v55 = vld [vmem:[%s820_s6 + $0x8] sm:$0xff]  ;;  %v240_v56 = vld [vmem:[%s820_s6] sm:$0xff]  ;;  %s552_s6 = smov [#allocation5]  }
  0x20   :  { %420 = vmatprep.subr.mxu0 %v550_v1  ;;  %453 = vmatprep.subr.mxu1 %v550_v1  ;;  %v350_v57 = vld [vmem:[%s819_s5] ss:$0 sm:$0xff]  ;;  %s340_s16 = sshll.u32 %s552_s6, 4  ;;  %s341_s16 = int_to_ptr.vmem [resolvable:$true] %s340_s16 }
  0x21   :  { %421 = vmatpush3.msra.mxu0 %v51_v15  ;;  %454 = vmatpush3.msra.mxu1 %v150_v18  ;;  %v352_v0 = vld [vmem:[%s821_s7] ss:$0 sm:$0xff]  ;;  %s525_s5 = scalar_lea.vmem %s341_s16, 128  ;;  %p530_p6 = scmp.lt.s32.totalorder %s341_s16, %s341_s16 }
  0x22   :  { %422 = vmatprep.subr.mxu0 %v550_v1  ;;  %455 = vmatprep.subr.mxu1 %v550_v1  ;;  %p526_p5 = scmp.ne.s32.totalorder %s341_s16, %s525_s5  ;;  %p531_p7 = scmp.lt.s32.totalorder %s525_s5, %s525_s5 }
  0x23   :  { %423 = vmatpush3.msra.mxu0 %v50_v17  ;;  %456 = vmatpush3.msra.mxu1 %v149_v20 }
  0x24   :  { %424 = vmatprep.subr.mxu0 %v550_v1  ;;  %457 = vmatprep.subr.mxu1 %v550_v1  ;;  %p532_p8 = por %p531_p7, %p530_p6 }
  0x25   :  { %425 = vmatpush3.msra.mxu0 %v49_v19  ;;  %458 = vmatpush3.msra.mxu1 %v148_v22 }
  0x26   :  { %426 = vmatprep.subr.mxu0 %v550_v1  ;;  %459 = vmatprep.subr.mxu1 %v550_v1  ;;  %p533_p9 = pnand %p532_p8, %p526_p5 }
  0x27   :  { %427 = vmatpush3.msra.mxu0 %v48_v21  ;;  %460 = vmatpush3.msra.mxu1 %v147_v24 }
  0x28   :  { %428 = vmatprep.subr.mxu0 %v550_v1  ;;  %461 = vmatprep.subr.mxu1 %v550_v1 }
  0x29   :  { %429 = vmatpush3.msra.mxu0 %v47_v23  ;;  %462 = vmatpush3.msra.mxu1 %v146_v26 }
  0x2a   :  { %430 = vmatprep.subr.mxu0 %v550_v1  ;;  %463 = vmatprep.subr.mxu1 %v550_v1 }
  0x2b   :  { %431 = vmatpush3.msra.mxu0 %v46_v25  ;;  %464 = vmatpush3.msra.mxu1 %v145_v28 }
  0x2c   :  { %432 = vmatprep.subr.mxu0 %v550_v1  ;;  %465 = vmatprep.subr.mxu1 %v550_v1 }
  0x2d   :  { %433 = vmatpush3.msra.mxu0 %v45_v27  ;;  %466 = vmatpush3.msra.mxu1 %v144_v31 }
  0x2e   :  { %434 = vmatprep.subr.mxu0 %v550_v1  ;;  %467 = vmatprep.subr.mxu1 %v550_v1 }
  0x2f   :  { %435 = vmatpush3.msra.mxu0 %v44_v29  ;;  %468 = vmatpush3.msra.mxu1 %v143_v32 }
  0x30   :  { %437 = vmatmul.mubr.f32.vlgmr.msra.gmra.mxu0 %v43_v30  ;;  %474 = vmatprep.subr.mxu0 %v550_v1 }
  0x31   :  { %506 = vmatprep.mubr.msk.f32.mxu0 %vm551_vm0, %v550_v1  ;;  %469 = vmatprep.subr.mxu1 %v550_v1 }
  0x32   :  { %470 = vmatpush3.msra.mxu1 %v142_v33  ;;  %475 = vmatpush3.msra.mxu0 %v255_v34 }
  0x33   :  { %476 = vmatprep.subr.mxu0 %v550_v1 }
  0x34   :  { %477 = vmatpush3.msra.mxu0 %v254_v35 }
  0x35   :  { %478 = vmatprep.subr.mxu0 %v550_v1 }
  0x36   :  { %479 = vmatpush3.msra.mxu0 %v253_v36 }
  0x37   :  { %480 = vmatprep.subr.mxu0 %v550_v1 }
  0x38   :  { %481 = vmatpush3.msra.mxu0 %v252_v37 }
  0x39   :  { %482 = vmatprep.subr.mxu0 %v550_v1 }
  0x3a   :  { %483 = vmatpush3.msra.mxu0 %v251_v38 }
  0x3b   :  { %484 = vmatprep.subr.mxu0 %v550_v1 }
  0x3c   :  { %485 = vmatpush3.msra.mxu0 %v250_v39 }
  0x3d   :  { %486 = vmatprep.subr.mxu0 %v550_v1 }
  0x3e   :  { %487 = vmatpush3.msra.mxu0 %v249_v40 }
  0x3f   :  { %488 = vmatprep.subr.mxu0 %v550_v1 }
  0x40   :  { %489 = vmatpush3.msra.mxu0 %v248_v41 }
  0x41   :  { %490 = vmatprep.subr.mxu0 %v550_v1 }
  0x42   :  { %491 = vmatpush3.msra.mxu0 %v247_v42 }
  0x43   :  { %492 = vmatprep.subr.mxu0 %v550_v1 }
  0x44   :  { %493 = vmatpush3.msra.mxu0 %v246_v43 }
  0x45   :  { %494 = vmatprep.subr.mxu0 %v550_v1 }
  0x46   :  { %495 = vmatpush3.msra.mxu0 %v245_v44 }
  0x47   :  { %496 = vmatprep.subr.mxu0 %v550_v1 }
  0x48   :  { %497 = vmatpush3.msra.mxu0 %v244_v45 }
  0x49   :  { %498 = vmatprep.subr.mxu0 %v550_v1 }
  0x4a   :  { %499 = vmatpush3.msra.mxu0 %v243_v46 }
  0x4b   :  { %500 = vmatprep.subr.mxu0 %v550_v1 }
  0x4c   :  { %501 = vmatpush3.msra.mxu0 %v242_v54 }
  0x4d   :  { %502 = vmatprep.subr.mxu0 %v550_v1 }
  0x4e   :  { %503 = vmatpush3.msra.mxu0 %v241_v55 }
  0x4f   :  { %504 = vmatprep.subr.mxu0 %v550_v1 }
  0x50   :  { %505 = vmatpush3.msra.mxu0 %v240_v56 }
  0xf0   :  { %v133_v48 = vpop.f32.mrf.mxu0 }
  0xf1   :  { %v134_v50 = vadd.f32 %v349_v47, %v133_v48 }
  0xf2   :  { %v438_v51 = vpop.f32.mrf.mxu0 }
  0xf3   :  { %v140_v52 = vmul.f32 %v139_v49, %v134_v50  ;;  %vm138_vm1 = vcmp.ge.f32.partialorder %v134_v50, 0.0 }
  0xf5   :  { %v141_v53 = vsel %vm138_vm1, %v134_v50, %v140_v52 }
  0xf6   :  { %472 = vmatmul.mubr.f32.vlgmr.msra.gmra.mxu1 %v141_v53 }
 0x1b6   :  { %v231_v58 = vpop.f32.mrf.mxu1 }
 0x1b7   :  { %v232_v60 = vadd.f32 %v350_v57, %v231_v58 }
 0x1b8   :  { %v473_v61 = vpop.f32.mrf.mxu1 }
 0x1b9   :  { %vm236_vm2 = vcmp.ge.f32.partialorder %v232_v60, 0.0  ;;  %v238_v62 = vmul.f32 %v237_v59, %v232_v60 }
 0x1bb   :  { %v239_v63 = vsel %vm236_vm2, %v232_v60, %v238_v62 }
 0x1bc   :  { %507 = vmatmul.mubr.f32.vlgmr.msra.gmra.mxu0 %v239_v63 }
 0x27c   :  { %v329_v1 = vpop.f32.mrf.mxu0 }
 0x27d   :  { %v330_v2 = vadd.f32 %v352_v0, %v329_v1 }
 0x27e   :  { %v508_v3 = vpop.f32.mrf.mxu0 }
 0x27f   :  { %333 = vst [vmem:[#allocation5] sm:$0xff] %v330_v2 }
 0x280   :  { %536 = shalt.err (!%p533_p9)
}
 0x281   :  { %343 = dma.vmem_to_hbm [thread:$0]  %s341_s16, 128, %s822_s8, [#allocation3]  }
 0x282   :  { %547 = dma.done.wait [#allocation3], 128  }
 0x283   :  { %548 = vsyncadd [#allocation3], 4294967168 }
 0x284   :  { %347 = vsyncpa [#allocation3], 1 }
 0x285   :  { %348 = vsyncpa [#allocation4], 1 }

</bundles_post_ra>
